<compile_context>
chip_gen: v7x
topology: tpu7x:2x2x1
jax: 0.10.0
libtpu: 0.0.40
codegen_flags: <defaults>
</compile_context>

<pallas_src>
import jax
import jax.numpy as jnp
import numpy as np
from jax.experimental import pallas as pl
from jax.experimental.pallas import tpu as pltpu


# ---------------------------------------------------------------------------
# Pass 1 kernel: reduce over the N grid points.
#   v     [Rt, Nt]   dense rows of the [B*Cin, N] view (free NCHW reshape)
#   xT    [2, Nt]    coordinates, coord-major
#   m0/m1 [Rt, 1]    per-row sums against x0 / x1, written at the last N step
#   acc0/acc1 [Rt,1] f32 accumulators (VMEM scratch, persist over the N axis)
# ---------------------------------------------------------------------------
def _reduce_kernel(v_ref, xT_ref, m0_ref, m1_ref, acc0_ref, acc1_ref):
    n_idx = pl.program_id(1)

    @pl.when(n_idx == 0)
    def _init():
        acc0_ref[...] = jnp.zeros_like(acc0_ref)
        acc1_ref[...] = jnp.zeros_like(acc1_ref)

    v = v_ref[...].astype(jnp.float32)          # [Rt, Nt]  (bf16 stream upcast in-vreg)
    x0 = xT_ref[0:1, :]                         # [1, Nt]
    x1 = xT_ref[1:2, :]
    # M_i[row] += sum_n v[row, n] * x_i[n]   (VPU multiply + XLU lane reduction)
    acc0_ref[...] += jnp.sum(v * x0, axis=-1, keepdims=True)   # [Rt, 1]
    acc1_ref[...] += jnp.sum(v * x1, axis=-1, keepdims=True)

    @pl.when(n_idx == pl.num_programs(1) - 1)
    def _finalize():
        m0_ref[...] = acc0_ref[...]
        m1_ref[...] = acc1_ref[...]


# ---------------------------------------------------------------------------
# Pass 2 kernel: broadcast W back over the grid points (store-bound).
#   W0/W1 [Rt, 1]  column blocks of the flattened [B*Cout, 1] matrices
#   xT    [2, Nt]
#   out   [Rt, Nt] u[(b,o), n] = W0*x0[n] + W1*x1[n]   (lane-dense store)
# ---------------------------------------------------------------------------
def _broadcast_kernel(w0_ref, w1_ref, xT_ref, out_ref):
    x0 = xT_ref[0:1, :]                         # [1, Nt]
    x1 = xT_ref[1:2, :]
    out_ref[...] = (w0_ref[...] * x0 + w1_ref[...] * x1).astype(out_ref.dtype)


# ---------------------------------------------------------------------------
# Sizing helpers (generation-aware; all blocks exactly divide the padded arrays).
# ---------------------------------------------------------------------------
def _round_up(x, m):
    return ((x + m - 1) // m) * m


def _vmem_capacity_bytes():
    try:
        return int(pltpu.get_tpu_info().vmem_capacity_bytes)
    except Exception:
        return 64 * 2**20       # conservative default (v7x per-TC VMEM)


def _vmem_limit(need_bytes, vmem_cap):
    hard_cap = int(vmem_cap * 3 // 4)           # headroom: 48 MiB on v7x, 96 MiB on v5e/v6e
    return int(min(hard_cap, max(16 * 2**20, 3 * int(need_bytes))))


def _pick_n_tile(n, target):
    """Return (Nt, N_pad): Nt is a multiple of 128 that divides N_pad >= n.

    Prefers an exact divisor of n (no padding); otherwise pads n up to a multiple of a
    128-multiple tile chosen so the relative padding waste stays small.
    """
    if n % 128 == 0:
        cap = min(target, n)
        for k in range(cap // 128, 0, -1):
            cand = 128 * k
            if n % cand == 0:
                return cand, n
    nt_cap = min(target, _round_up(n, 128))
    waste_cap = max(128, (n // 8) // 128 * 128)      # keep padding waste <= ~12.5%
    nt = max(128, min(nt_cap, waste_cap))
    return nt, _round_up(n, nt)


def _pick_row_tile(rows, max_rows, prefer_split=True):
    """rows is a multiple of 8. Return the largest multiple-of-8 divisor of rows that is
    <= max_rows, preferring a choice that leaves >= 2 row blocks (v7x megacore)."""
    best = 8
    limit = min(max(max_rows, 8), rows)
    for k in range(limit // 8, 0, -1):
        cand = 8 * k
        if rows % cand == 0:
            best = cand
            break
    if prefer_split and best == rows and rows > 8:
        for k in range((rows // 2) // 8, 0, -1):
            cand = 8 * k
            if rows % cand == 0:
                return cand
    return best


# ---------------------------------------------------------------------------
# Forward wrapper.
# ---------------------------------------------------------------------------
def low_rank_linear_forward(v, x, psi, phi, *, stream_dtype=jnp.float32,
                            out_dtype=None):
    """Pallas forward.  v: [B, Cin, H, W] (NCHW), x: [H, W, 2] -> u: [B, Cout, H, W].

    stream_dtype: dtype of the pass-1 v read stream (f32 default; bf16 halves HBM read,
                  accumulation stays f32 -- re-validate tolerance before enabling).
    out_dtype:    dtype of the u store stream (default f32).
    """
    B, Cin, H, W_sp = v.shape
    N = H * W_sp
    R = psi.shape[0]
    Cout = phi.shape[0]
    f32 = jnp.float32
    out_dtype = f32 if out_dtype is None else out_dtype

    # ---- generation-aware budgets ------------------------------------------
    vmem_cap = _vmem_capacity_bytes()
    big_vmem = vmem_cap >= 96 * 2**20            # v5e / v6e (128 MiB) vs v7x (64 MiB)
    vblock_target = (8 << 20) if big_vmem else (3 << 20)
    nt_target = 8192 if big_vmem else 4096

    # ---- layout plumbing (free reshapes; NO transpose of v) -----------------
    BCi = B * Cin
    BCo = B * Cout
    v2d = v.reshape(BCi, N).astype(stream_dtype)     # free reshape of contiguous NCHW
    xT = x.reshape(N, 2).T.astype(f32)               # [2, N]  (tiny)

    # delta_x = x[0, 1, 0] - x[0, 0, 0] (module's convention: uniform grid, x-coordinate
    # in channel 0 varying along W).
    dx = x[0, 1, 0] - x[0, 0, 0]
    dx2 = (dx * dx).astype(f32)

    # ---- tiles and (only-if-needed) padding ----------------------------------
    Nt, N_pad = _pick_n_tile(N, nt_target)
    BCi_pad = _round_up(BCi, 8)
    in_isz = jnp.dtype(stream_dtype).itemsize
    max_rows1 = max(8, (vblock_target // (Nt * in_isz)) // 8 * 8)
    Rt1 = _pick_row_tile(BCi_pad, max_rows1)

    if N_pad != N or BCi_pad != BCi:
        # zero padding is exact for the N reduction; padded rows are sliced off below.
        v2d = jnp.pad(v2d, ((0, BCi_pad - BCi), (0, N_pad - N)))
    xTp = jnp.pad(xT, ((0, 0), (0, N_pad - N))) if N_pad != N else xT

    # ---- pass 1: reduction over grid points ---------------------------------
    grid1 = (BCi_pad // Rt1, N_pad // Nt)
    need1 = (2 * Rt1 * Nt * in_isz               # v block, double-buffered
             + 2 * 2 * Nt * 4                    # xT block
             + 2 * 2 * Rt1 * 4 * 2               # m0/m1 output blocks
             + 2 * Rt1 * 4)                      # accumulators
    bytes1 = BCi_pad * N_pad * in_isz + 2 * N_pad * 4 + 2 * BCi_pad * 4
    flops1 = 4 * BCi_pad * N_pad

    m0, m1 = pl.pallas_call(
        _reduce_kernel,
        out_shape=(jax.ShapeDtypeStruct((BCi_pad, 1), f32),
                   jax.ShapeDtypeStruct((BCi_pad, 1), f32)),
        grid=grid1,
        in_specs=[
            pl.BlockSpec((Rt1, Nt), lambda r, n: (r, n)),       # v rows
            pl.BlockSpec((2, Nt), lambda r, n: (0, n)),         # xT
        ],
        out_specs=(pl.BlockSpec((Rt1, 1), lambda r, n: (r, 0)),
                   pl.BlockSpec((Rt1, 1), lambda r, n: (r, 0))),
        scratch_shapes=[pltpu.VMEM((Rt1, 1), f32),
                        pltpu.VMEM((Rt1, 1), f32)],
        compiler_params=pltpu.CompilerParams(
            dimension_semantics=("parallel", "arbitrary"),
            vmem_limit_bytes=_vmem_limit(need1, vmem_cap)),
        cost_estimate=pl.CostEstimate(flops=int(flops1), transcendentals=0,
                                      bytes_accessed=int(bytes1)),
    )(v2d, xTp)

    # ---- tiny matmuls outside the hot loop (plain JAX / XLA) -----------------
    # TODO(synk): integral_2d source not provided; implemented as a Riemann sum
    #             (sum over H, W) * dx^2 in both the kernel and the reference.
    M0 = m0[:BCi, 0].reshape(B, Cin)
    M1 = m1[:BCi, 0].reshape(B, Cin)
    psi0T = psi[:, :, 0].T.astype(f32) * dx2         # [Cin, R]  (dx^2 folded in)
    psi1T = psi[:, :, 1].T.astype(f32) * dx2
    phi0T = phi[:, :, 0].T.astype(f32)               # [R, Cout]
    phi1T = phi[:, :, 1].T.astype(f32)
    l2 = M0 @ psi0T + M1 @ psi1T                     # [B, R]
    W0 = (l2 @ phi0T).reshape(BCo, 1)                # [B*Cout, 1]
    W1 = (l2 @ phi1T).reshape(BCo, 1)

    # ---- pass 2: broadcast W over the grid points (lane-dense u store) -------
    BCo_pad = _round_up(BCo, 8)
    out_isz = jnp.dtype(out_dtype).itemsize
    max_rows2 = max(8, (vblock_target // (Nt * out_isz)) // 8 * 8)
    Rt2 = _pick_row_tile(BCo_pad, max_rows2)
    if BCo_pad != BCo:
        W0 = jnp.pad(W0, ((0, BCo_pad - BCo), (0, 0)))
        W1 = jnp.pad(W1, ((0, BCo_pad - BCo), (0, 0)))

    grid2 = (BCo_pad // Rt2, N_pad // Nt)
    need2 = 2 * Rt2 * Nt * out_isz + 2 * 2 * Nt * 4 + 2 * 2 * Rt2 * 4
    bytes2 = BCo_pad * N_pad * out_isz + 2 * N_pad * 4 + 2 * BCo_pad * 4
    flops2 = 3 * BCo_pad * N_pad

    u2d = pl.pallas_call(
        _broadcast_kernel,
        out_shape=jax.ShapeDtypeStruct((BCo_pad, N_pad), out_dtype),
        grid=grid2,
        in_specs=[
            pl.BlockSpec((Rt2, 1), lambda r, n: (r, 0)),         # W0 column
            pl.BlockSpec((Rt2, 1), lambda r, n: (r, 0)),         # W1 column
            pl.BlockSpec((2, Nt), lambda r, n: (0, n)),          # xT
        ],
        out_specs=pl.BlockSpec((Rt2, Nt), lambda r, n: (r, n)),
        compiler_params=pltpu.CompilerParams(
            dimension_semantics=("parallel", "parallel"),
            vmem_limit_bytes=_vmem_limit(need2, vmem_cap)),
        cost_estimate=pl.CostEstimate(flops=int(flops2), transcendentals=0,
                                      bytes_accessed=int(bytes2)),
    )(W0, W1, xTp)

    return u2d[:BCo, :N].reshape(B, Cout, H, W_sp)


def reference_forward(v, x, psi, phi):
    """Pure-JAX transcription of the PyTorch module (for validation)."""
    psi_hw = jnp.einsum('rix,hwx->hwri', psi, x)
    phi_hw = jnp.einsum('orx,hwx->hwro', phi, x)
    vp = jnp.transpose(v, (0, 2, 3, 1))
    inner = jnp.einsum('bhwi,hwri->bhwr', vp, psi_hw)
    dx = x[0, 1, 0] - x[0, 0, 0]
    l2 = jnp.sum(inner, axis=(1, 2)) * dx * dx
    u = jnp.einsum('br,hwro->bhwo', l2, phi_hw)
    return jnp.transpose(u, (0, 3, 1, 2))


if __name__ == "__main__":
    # Small, deterministic setup consistent with the module.
    B, Cin, Cout, R, H, W = 2, 4, 6, 5, 16, 16
    hidden_channels = 32  # present in __init__ signature but unused in forward

    key = jax.random.PRNGKey(0)
    k_v, k_psi, k_phi = jax.random.split(key, 3)

    # Deterministic Kaiming-normal-style init (fan_in = dim1 * prod(dims[2:])).
    psi = jax.random.normal(k_psi, (R, Cin, 2), jnp.float32) * np.sqrt(2.0 / (Cin * 2))
    phi = jax.random.normal(k_phi, (Cout, R, 2), jnp.float32) * np.sqrt(2.0 / (R * 2))

    # Input function (NCHW, as in PyTorch) and coordinate grid [H, W, 2] with
    # channel 0 varying along W so delta_x = x[0,1,0] - x[0,0,0] != 0.
    v = jax.random.normal(k_v, (B, Cin, H, W), jnp.float32)
    xs = jnp.linspace(0.0, 1.0, W)
    ys = jnp.linspace(0.0, 1.0, H)
    x = jnp.stack(jnp.meshgrid(xs, ys, indexing="xy"), axis=-1)

    fwd = jax.jit(low_rank_linear_forward)
    u = fwd(v, x, psi, phi)
    u = jax.block_until_ready(u)

    u_ref = reference_forward(v, x, psi, phi)
    np.testing.assert_allclose(np.asarray(u), np.asarray(u_ref), rtol=1e-4, atol=1e-5)
    assert u.shape == (B, Cout, H, W)

    print("KERNEL_OK")
</pallas_src>

<mosaic_0001>
module attributes {stable_mosaic.version = 11 : i64} {
  func.func @_reduce_kernel(%arg0: i32, %arg1: i32, %arg2: memref<8x256xf32, #tpu.memory_space<vmem>>, %arg3: memref<2x256xf32, #tpu.memory_space<vmem>>, %arg4: memref<8x1xf32, #tpu.memory_space<vmem>>, %arg5: memref<8x1xf32, #tpu.memory_space<vmem>>, %arg6: memref<8x1xf32, #tpu.memory_space<vmem>>, %arg7: memref<8x1xf32, #tpu.memory_space<vmem>>) attributes {dimension_semantics = [#tpu.dimension_semantics<parallel>, #tpu.dimension_semantics<arbitrary>], iteration_bounds = array<i64: 1, 1>, scalar_prefetch = 0 : i64, scratch_operands = 2 : i64, tpu.core_type = #tpu.core_type<tc>, window_params = [{transform_indices = @transform_0, window_bounds = array<i64: 8, 256>}, {transform_indices = @transform_1, window_bounds = array<i64: 2, 256>}, {transform_indices = @transform_2, window_bounds = array<i64: 8, 1>}, {transform_indices = @transform_3, window_bounds = array<i64: 8, 1>}]} {
    %c0_i32 = arith.constant 0 : i32
    %0 = arith.cmpi eq, %arg1, %c0_i32 : i32
    %1 = arith.extui %0 : i1 to i32
    %c0_i32_0 = arith.constant 0 : i32
    %2 = arith.cmpi ne, %1, %c0_i32_0 : i32
    scf.if %2 {
      %cst_16 = arith.constant 0.000000e+00 : f32
      %23 = vector.broadcast %cst_16 : f32 to vector<8x1xf32>
      %c0_17 = arith.constant 0 : index
      %c0_18 = arith.constant 0 : index
      %24 = vector.load %arg6[%c0_17, %c0_18] : memref<8x1xf32, #tpu.memory_space<vmem>>, vector<8x1xf32>
      tpu.vector_store %arg6[%c0_17, %c0_18], %23 {strides = array<i32>} : memref<8x1xf32, #tpu.memory_space<vmem>>, vector<8x1xf32>,
      %cst_19 = arith.constant 0.000000e+00 : f32
      %25 = vector.broadcast %cst_19 : f32 to vector<8x1xf32>
      %c0_20 = arith.constant 0 : index
      %c0_21 = arith.constant 0 : index
      %26 = vector.load %arg7[%c0_20, %c0_21] : memref<8x1xf32, #tpu.memory_space<vmem>>, vector<8x1xf32>
      tpu.vector_store %arg7[%c0_20, %c0_21], %25 {strides = array<i32>} : memref<8x1xf32, #tpu.memory_space<vmem>>, vector<8x1xf32>,
    } else {
    }
    %c0 = arith.constant 0 : index
    %c0_1 = arith.constant 0 : index
    %3 = vector.load %arg2[%c0, %c0_1] : memref<8x256xf32, #tpu.memory_space<vmem>>, vector<8x256xf32>
    %c0_2 = arith.constant 0 : index
    %c0_3 = arith.constant 0 : index
    %4 = vector.load %arg3[%c0_2, %c0_3] : memref<2x256xf32, #tpu.memory_space<vmem>>, vector<1x256xf32>
    %c1 = arith.constant 1 : index
    %c0_4 = arith.constant 0 : index
    %5 = vector.load %arg3[%c1, %c0_4] : memref<2x256xf32, #tpu.memory_space<vmem>>, vector<1x256xf32>
    %c0_5 = arith.constant 0 : index
    %c0_6 = arith.constant 0 : index
    %6 = vector.load %arg6[%c0_5, %c0_6] : memref<8x1xf32, #tpu.memory_space<vmem>>, vector<8x1xf32>
    %7 = vector.broadcast %4 : vector<1x256xf32> to vector<8x256xf32>
    %8 = arith.mulf %3, %7 : vector<8x256xf32>
    %cst = arith.constant dense<0.000000e+00> : vector<8xf32>
    %9 = vector.multi_reduction <add>, %8, %cst [1] : vector<8x256xf32> to vector<8xf32>
    %10 = vector.shape_cast %9 : vector<8xf32> to vector<8x1xf32>
    %11 = arith.addf %6, %10 : vector<8x1xf32>
    %c0_7 = arith.constant 0 : index
    %c0_8 = arith.constant 0 : index
    %12 = vector.load %arg6[%c0_7, %c0_8] : memref<8x1xf32, #tpu.memory_space<vmem>>, vector<8x1xf32>
    tpu.vector_store %arg6[%c0_7, %c0_8], %11 {strides = array<i32>} : memref<8x1xf32, #tpu.memory_space<vmem>>, vector<8x1xf32>,
    %c0_9 = arith.constant 0 : index
    %c0_10 = arith.constant 0 : index
    %13 = vector.load %arg7[%c0_9, %c0_10] : memref<8x1xf32, #tpu.memory_space<vmem>>, vector<8x1xf32>
    %14 = vector.broadcast %5 : vector<1x256xf32> to vector<8x256xf32>
    %15 = arith.mulf %3, %14 : vector<8x256xf32>
    %cst_11 = arith.constant dense<0.000000e+00> : vector<8xf32>
    %16 = vector.multi_reduction <add>, %15, %cst_11 [1] : vector<8x256xf32> to vector<8xf32>
    %17 = vector.shape_cast %16 : vector<8xf32> to vector<8x1xf32>
    %18 = arith.addf %13, %17 : vector<8x1xf32>
    %c0_12 = arith.constant 0 : index
    %c0_13 = arith.constant 0 : index
    %19 = vector.load %arg7[%c0_12, %c0_13] : memref<8x1xf32, #tpu.memory_space<vmem>>, vector<8x1xf32>
    tpu.vector_store %arg7[%c0_12, %c0_13], %18 {strides = array<i32>} : memref<8x1xf32, #tpu.memory_space<vmem>>, vector<8x1xf32>,
    %c0_i32_14 = arith.constant 0 : i32
    %20 = arith.cmpi eq, %arg1, %c0_i32_14 : i32
    %21 = arith.extui %20 : i1 to i32
    %c0_i32_15 = arith.constant 0 : i32
    %22 = arith.cmpi ne, %21, %c0_i32_15 : i32
    scf.if %22 {
      %c0_16 = arith.constant 0 : index
      %c0_17 = arith.constant 0 : index
      %23 = vector.load %arg6[%c0_16, %c0_17] : memref<8x1xf32, #tpu.memory_space<vmem>>, vector<8x1xf32>
      %c0_18 = arith.constant 0 : index
      %c0_19 = arith.constant 0 : index
      %24 = vector.load %arg4[%c0_18, %c0_19] : memref<8x1xf32, #tpu.memory_space<vmem>>, vector<8x1xf32>
      tpu.vector_store %arg4[%c0_18, %c0_19], %23 {strides = array<i32>} : memref<8x1xf32, #tpu.memory_space<vmem>>, vector<8x1xf32>,
      %c0_20 = arith.constant 0 : index
      %c0_21 = arith.constant 0 : index
      %25 = vector.load %arg7[%c0_20, %c0_21] : memref<8x1xf32, #tpu.memory_space<vmem>>, vector<8x1xf32>
      %c0_22 = arith.constant 0 : index
      %c0_23 = arith.constant 0 : index
      %26 = vector.load %arg5[%c0_22, %c0_23] : memref<8x1xf32, #tpu.memory_space<vmem>>, vector<8x1xf32>
      tpu.vector_store %arg5[%c0_22, %c0_23], %25 {strides = array<i32>} : memref<8x1xf32, #tpu.memory_space<vmem>>, vector<8x1xf32>,
    } else {
    }
    return
  }
  func.func @transform_0(%arg0: i32, %arg1: i32) -> (i32, i32) {
    %c0_i32 = arith.constant 0 : i32
    return %arg0, %arg1 : i32, i32
  }
  func.func @transform_1(%arg0: i32, %arg1: i32) -> (i32, i32) {
    %c0_i32 = arith.constant 0 : i32
    %c0_i32_0 = arith.constant 0 : i32
    return %c0_i32, %arg1 : i32, i32
  }
  func.func @transform_2(%arg0: i32, %arg1: i32) -> (i32, i32) {
    %c0_i32 = arith.constant 0 : i32
    %c0_i32_0 = arith.constant 0 : i32
    return %arg0, %c0_i32 : i32, i32
  }
  func.func @transform_3(%arg0: i32, %arg1: i32) -> (i32, i32) {
    %c0_i32 = arith.constant 0 : i32
    %c0_i32_0 = arith.constant 0 : i32
    return %arg0, %c0_i32 : i32, i32
  }
}

module attributes {stable_mosaic.version = 11 : i64} {
  func.func @_broadcast_kernel(%arg0: i32, %arg1: i32, %arg2: memref<8x1xf32, #tpu.memory_space<vmem>>, %arg3: memref<8x1xf32, #tpu.memory_space<vmem>>, %arg4: memref<2x256xf32, #tpu.memory_space<vmem>>, %arg5: memref<8x256xf32, #tpu.memory_space<vmem>>) attributes {dimension_semantics = [#tpu.dimension_semantics<parallel>, #tpu.dimension_semantics<parallel>], iteration_bounds = array<i64: 2, 1>, scalar_prefetch = 0 : i64, scratch_operands = 0 : i64, tpu.core_type = #tpu.core_type<tc>, window_params = [{transform_indices = @transform_0, window_bounds = array<i64: 8, 1>}, {transform_indices = @transform_1, window_bounds = array<i64: 8, 1>}, {transform_indices = @transform_2, window_bounds = array<i64: 2, 256>}, {transform_indices = @transform_3, window_bounds = array<i64: 8, 256>}]} {
    %c0 = arith.constant 0 : index
    %c0_0 = arith.constant 0 : index
    %0 = vector.load %arg4[%c0, %c0_0] : memref<2x256xf32, #tpu.memory_space<vmem>>, vector<1x256xf32>
    %c1 = arith.constant 1 : index
    %c0_1 = arith.constant 0 : index
    %1 = vector.load %arg4[%c1, %c0_1] : memref<2x256xf32, #tpu.memory_space<vmem>>, vector<1x256xf32>
    %c0_2 = arith.constant 0 : index
    %c0_3 = arith.constant 0 : index
    %2 = vector.load %arg2[%c0_2, %c0_3] : memref<8x1xf32, #tpu.memory_space<vmem>>, vector<8x1xf32>
    %3 = vector.broadcast %2 : vector<8x1xf32> to vector<8x256xf32>
    %4 = vector.broadcast %0 : vector<1x256xf32> to vector<8x256xf32>
    %5 = arith.mulf %3, %4 : vector<8x256xf32>
    %c0_4 = arith.constant 0 : index
    %c0_5 = arith.constant 0 : index
    %6 = vector.load %arg3[%c0_4, %c0_5] : memref<8x1xf32, #tpu.memory_space<vmem>>, vector<8x1xf32>
    %7 = vector.broadcast %6 : vector<8x1xf32> to vector<8x256xf32>
    %8 = vector.broadcast %1 : vector<1x256xf32> to vector<8x256xf32>
    %9 = arith.mulf %7, %8 : vector<8x256xf32>
    %10 = arith.addf %5, %9 : vector<8x256xf32>
    %c0_6 = arith.constant 0 : index
    %c0_7 = arith.constant 0 : index
    %11 = vector.load %arg5[%c0_6, %c0_7] : memref<8x256xf32, #tpu.memory_space<vmem>>, vector<8x256xf32>
    tpu.vector_store %arg5[%c0_6, %c0_7], %10 {strides = array<i32>} : memref<8x256xf32, #tpu.memory_space<vmem>>, vector<8x256xf32>,
    return
  }
  func.func @transform_0(%arg0: i32, %arg1: i32) -> (i32, i32) {
    %c0_i32 = arith.constant 0 : i32
    %c0_i32_0 = arith.constant 0 : i32
    return %arg0, %c0_i32 : i32, i32
  }
  func.func @transform_1(%arg0: i32, %arg1: i32) -> (i32, i32) {
    %c0_i32 = arith.constant 0 : i32
    %c0_i32_0 = arith.constant 0 : i32
    return %arg0, %c0_i32 : i32, i32
  }
  func.func @transform_2(%arg0: i32, %arg1: i32) -> (i32, i32) {
    %c0_i32 = arith.constant 0 : i32
    %c0_i32_0 = arith.constant 0 : i32
    return %c0_i32, %arg1 : i32, i32
  }
  func.func @transform_3(%arg0: i32, %arg1: i32) -> (i32, i32) {
    %c0_i32 = arith.constant 0 : i32
    return %arg0, %arg1 : i32, i32
  }
}

</mosaic_0001>

<bundles_post_ra>
// kernel: squeeze.11
= control target key start
LH: loop header
LB: loop body
LE: loop exit
PB: predicated region body
PF: predicated region fallthrough
CT: control target
= control target key end

     0   :  { %vm19_vm0 = vcmask 31744   ;;  %v38_v6 = vmov 0.0   ;;  %s55_s0 = inlined_call_operand.vmem [shape: bf16[8], index: 0, kind: input, shape index: {}]   ;;  %s56_s1 = inlined_call_operand.vmem [shape: bf16[2,4], index: 1, kind: output, shape index: {}]  }
   0x1   :  { %v14_v0 = vld [vmem:[%s55_s0] sm:$0x1]  ;;  %s37_s0 = smov 124  }
   0x2   :  { %v15_v1 = vunpack.c.l.bf16 %v14_v0 }
   0x4   :  { %17 = vst [vmem:[#allocation1] sm:$0x3] %v15_v1 }
   0xb   :  { %v21_v2 = vld [vmem:[#allocation1] sm:$0x1]  }
   0xc   :  { %v18_v3 = vld [vmem:[#allocation1] sm:$0x1]   ;;  %22 = vrot.lane.b32.xlu0 %v21_v2, %s37_s0 }
   0xd   :  { %20 = vst.msk [vmem:[#allocation0] sm:$0x1] %vm19_vm0, %v18_v3  }
  0x7e   :  { %v23_v4 = vpop.permute.xlu0 %22  }
  0x7f   :  { %26 = vst.msk [vmem:[#allocation0 + $0x1] sm:$0x1] %vm19_vm0, %v23_v4  }
  0x86   :  { %v31_v5 = vld [vmem:[#allocation0] sm:$0x3] }
  0x87   :  { %v32_v7 = vpack.c.bf16 %v38_v6, %v31_v5 }
  0x89   :  { %34 = vst [vmem:[%s56_s1] sm:$0x1] %v32_v7 }

// kernel: low_rank_linear_forward.3
= control target key start
LH: loop header
LB: loop body
LE: loop exit
PB: predicated region body
PF: predicated region fallthrough
CT: control target
= control target key end

     0   :  { %s468_s12 = smov 0   ;;  %s470_s13 = smov 0   ;;  %s510_s0 = inlined_call_operand.vmem [shape: f32[16,1], index: 0, kind: input, shape index: {}]   ;;  %s511_s1 = inlined_call_operand.vmem [shape: f32[16,1], index: 1, kind: input, shape index: {}]   ;;  %s512_s2 = inlined_call_operand.vmem [shape: f32[2,256], index: 2, kind: input, shape index: {}]   ;;  %s513_s3 = inlined_call_operand.vmem [shape: f32[16,256], index: 3, kind: output, shape index: {}]  }
   0x1   :  { %s472_s14 = smov 0  }
   0x2 LB: > { %s25_s15 = sadd.s32 1, %s441_s13  ;;  %p388_p0 = scmp.ge.s32.totalorder %s445_s14, 1  ;;  %s445_s14 = sphi %s472_s14, %s13_s14   ;;  %s441_s13 = sphi %s470_s13, %s515_s13   ;;  %s437_s12 = sphi %s468_s12, %s514_s12  }
   0x3   : > { %p27_p1 = scmp.ge.s32.totalorder %s25_s15, 2  ;;  %p170_p2 = scmp.lt.s32.totalorder %s445_s14, 3 }
   0x5   : > { %s517_s15 = smov (%p27_p1, %s25_s15), 0  ;;  %p171_p3 = pnand %p388_p0, %p170_p2 }
   0x6   : > { %p206_p4 = scmp.lt.s32.totalorder (!%p171_p3), %s437_s12, 1  ;;  %v447_v0 = vmov (!%p171_p3), 0   ;;  %v240_v3 = vlaneseq (!%p171_p3)  ;;  %v230_v7 = vld [vmem:[%s512_s2] ss:$2 sm:$0x3] (!%p171_p3) }
   0x7   : > { %174 = sbr.rel (%p171_p3) target bundleno = 155 (0x9b), region = 32  ;;  %422 = vset.pattern.permute.xlu0 (!%p171_p3), %v447_v0  ;;  %v393_v8 = vld [vmem:[%s512_s2 + $0x1] ss:$2 sm:$0x3] (!%p171_p3) }
   0x8   : > { %v241_v4 = vshrl.u32 (!%p171_p3), %v240_v3, 7 }
   0xa   : > { %v242_v5 = vsub.s32 (!%p171_p3), 0, %v241_v4  ;;  %v246_v6 = vsub.s32 (!%p171_p3), 1, %v241_v4 }
   0xc   : > { %v243_v10 = vrot.slane (!%p171_p3), %v230_v7, %v242_v5  ;;  %v247_v11 = vrot.slane (!%p171_p3), %v230_v7, %v246_v6  ;;  %v262_v12 = vrot.slane (!%p171_p3), %v393_v8, %v242_v5  ;;  %v266_v13 = vrot.slane (!%p171_p3), %v393_v8, %v246_v6 }
   0xe   : > { %s519_s12 = smov (!%p206_p4, %s437_s12), 1 }
   0xf   : > { %s389_s16 = sshll.u32 %s519_s12, 3  ;;  %s396_s27 = sshll.u32 %s519_s12, 4 }
  0x10   : > { %s209_s19 = scalar_lea.vmem %s510_s0, %s389_s16  ;;  %s213_s22 = scalar_lea.vmem %s511_s1, %s389_s16 }
  0x11   : > { %v233_v1 = vld [vmem:[%s209_s19] sm:$0xff]  ;;  %s228_s30 = scalar_lea.vmem %s513_s3, %s396_s27 }
  0x12   : > { %236 = vperm.xlu0 %422, %v233_v1   ;;  %v252_v2 = vld [vmem:[%s213_s22] sm:$0xff] }
  0x16   : > { %255 = vperm.xlu0 %422, %v252_v2  }
  0x91   : > { %v237_v9 = vpop.permute.xlu0 %236 }
  0x92   : > { %v250_v15 = vmul.f32 %v243_v10, %v237_v9  ;;  %v251_v16 = vmul.f32 %v247_v11, %v237_v9 }
  0x95   : > { %v256_v14 = vpop.permute.xlu0 %255 }
  0x96   : > { %v269_v17 = vmul.f32 %v262_v12, %v256_v14  ;;  %v270_v18 = vmul.f32 %v266_v13, %v256_v14 }
  0x98   : > { %v271_v19 = vadd.f32 %v269_v17, %v250_v15  ;;  %v272_v20 = vadd.f32 %v270_v18, %v251_v16 }
  0x9a   : > { %273 = vst [vmem:[%s228_s30] sm:$0xff] %v271_v19  ;;  %274 = vst [vmem:[%s228_s30 + $0x8] sm:$0xff] %v272_v20 }
  0x9b PF: > { %s13_s14 = sadd.s32 1, %s445_s14   ;;  %s514_s12 = smov %s441_s13 }
  0x9c   : > { %p10_p5 = scmp.ge.s32.totalorder %s13_s14, 4   ;;  %s515_s13 = smov %s517_s15 }
  0x9e   :  { %12 = sbr.rel (!%p10_p5) target bundleno = 2 (0x2), region = 69 }

// kernel: low_rank_linear_forward.2
= control target key start
LH: loop header
LB: loop body
LE: loop exit
PB: predicated region body
PF: predicated region fallthrough
CT: control target
= control target key end

     0   :  { %v27_v0 = vlaneseq  ;;  %vm17_vm0 = vcmask 7168   ;;  %v81_v1 = vmov 0.0   ;;  %s126_s1 = inlined_call_operand.vmem [shape: f32[2,256], index: 1, kind: input, shape index: {}]   ;;  %s127_s0 = inlined_call_operand.vmem [shape: f32[8,256], index: 0, kind: input, shape index: {}]   ;;  %s128_s2 = inlined_call_operand.vmem [shape: f32[8,1], index: 2, kind: output, shape index: {0}]   ;;  %s129_s3 = inlined_call_operand.vmem [shape: f32[8,1], index: 3, kind: output, shape index: {1}]  }
   0x1   :  { %18 = vst.msk [vmem:[#allocation2] sm:$0xff] %vm17_vm0, %v81_v1  ;;  %19 = vst.msk [vmem:[#allocation3] sm:$0xff] %vm17_vm0, %v81_v1  ;;  %v22_v3 = vld [vmem:[%s126_s1] ss:$2 sm:$0x3]  ;;  %v21_v8 = vld [vmem:[%s127_s0 + $0x8] sm:$0xff] }
   0x2   :  { %v28_v2 = vshrl.u32 %v27_v0, 7  ;;  %v79_v4 = vld [vmem:[%s126_s1 + $0x1] ss:$2 sm:$0x3] }
   0x3   :  { %v20_v7 = vld [vmem:[%s127_s0] sm:$0xff] }
   0x4   :  { %v29_v5 = vsub.s32 0, %v28_v2  ;;  %v33_v6 = vsub.s32 1, %v28_v2 }
   0x6   :  { %v30_v9 = vrot.slane %v22_v3, %v29_v5  ;;  %v34_v10 = vrot.slane %v22_v3, %v33_v6  ;;  %v50_v11 = vrot.slane %v79_v4, %v29_v5  ;;  %v54_v12 = vrot.slane %v79_v4, %v33_v6 }
   0x8   :  { %v37_v13 = vmul.f32 %v30_v9, %v20_v7  ;;  %v38_v14 = vmul.f32 %v34_v10, %v21_v8  ;;  %v57_v15 = vmul.f32 %v50_v11, %v20_v7  ;;  %v58_v16 = vmul.f32 %v54_v12, %v21_v8  ;;  %v25_v19 = vld [vmem:[#allocation2] sm:$0xff]  ;;  %v45_v22 = vld [vmem:[#allocation3] sm:$0xff] }
   0xa   :  { %v39_v17 = vadd.f32 %v38_v14, %v37_v13  ;;  %v59_v18 = vadd.f32 %v58_v16, %v57_v15 }
   0xc   :  { %40 = vadd.xlane.f32.xlu0 %v39_v17 }
  0x10   :  { %60 = vadd.xlane.f32.xlu0 %v59_v18 }
  0x99   :  { %v41_v20 = vpop.xlane.xlu0 %40 }
  0x9a   :  { %v42_v21 = vadd.f32 %v41_v20, %v25_v19 }
  0x9c   :  { %44 = vst.msk [vmem:[#allocation2] sm:$0xff] %vm17_vm0, %v42_v21 }
  0x9d   :  { %v61_v23 = vpop.xlane.xlu0 %60 }
  0x9e   :  { %v62_v24 = vadd.f32 %v61_v23, %v45_v22 }
  0xa0   :  { %63 = vst.msk [vmem:[#allocation3] sm:$0xff] %vm17_vm0, %v62_v24 }
  0xa3   :  { %v67_v25 = vld [vmem:[#allocation2] sm:$0xff] }
  0xa4   :  { %68 = vst.msk [vmem:[%s128_s2] sm:$0xff] %vm17_vm0, %v67_v25 }
  0xa7   :  { %v69_v26 = vld [vmem:[#allocation3] sm:$0xff] }
  0xa8   :  { %70 = vst.msk [vmem:[%s129_s3] sm:$0xff] %vm17_vm0, %v69_v26 }

</bundles_post_ra>
